<compile_context>
chip_gen: v6e
topology: v6e:2x2x1
jax: 0.10.0
libtpu: 0.0.40
codegen_flags: <defaults>
</compile_context>

<pallas_src>
import math

import jax
import jax.numpy as jnp
from jax.experimental import pallas as pl
from jax.experimental.pallas import tpu as pltpu


def _pbb_kernel(a_ref, b_ref, x_ref, o_ref):
    # a_ref, b_ref: (1, W) float32 ; x_ref, o_ref: (tm, W) x.dtype
    # Elementwise fused multiply-add; a/b broadcast over the sublane (row)
    # axis and stay in f32 (cast on store) for bf16/int inputs.
    x = x_ref[...].astype(jnp.float32)
    o_ref[...] = (a_ref[...] * x + b_ref[...]).astype(o_ref.dtype)


_LANE = 128
_MAX_LANE_WIDTH = 2048            # preferred lane-dense row width
_MAX_LANE_GUARD = 65536           # give up on lane-dense padding past this
_TARGET_BLOCK_BYTES = 6 << 20     # ~6 MiB blocks (review: 4-8 MiB sweet spot)
_MIN_SPLIT_BYTES = 256 << 10      # below this, a single grid step is fine
_VMEM_HEADROOM = 8 << 20


def _sublane(itemsize):
    """Dtype-aware sublane multiple: 8 for f32, 16 for bf16, 32 for int8."""
    return max(8, 32 // max(1, itemsize))


def _lcm(a, b):
    return (a * b) // math.gcd(a, b)


def _pick_lane_width(total, d):
    """Largest W <= _MAX_LANE_WIDTH with W % lcm(d,128) == 0 and total % W == 0."""
    base = _lcm(d, _LANE)
    if base > _MAX_LANE_WIDTH or total % base != 0:
        return None
    k_max = min(_MAX_LANE_WIDTH // base, total // base)
    for k in range(k_max, 0, -1):
        w = base * k
        if total % w == 0:
            return w
    return None


def _pick_row_tile(m, w, itemsize, sublane):
    """Rows per block.

    Tiny arrays run in one step.  Otherwise target ~_TARGET_BLOCK_BYTES per
    block but force >= 2 grid steps (preferring an even step count) so the
    "parallel" grid axis shards the stream across both v7x TensorCores.
    """
    row_bytes = w * itemsize
    total_bytes = m * row_bytes
    if m < 2 * sublane or total_bytes <= _MIN_SPLIT_BYTES:
        return m                                   # single block, grid=(1,)

    max_tile = max(sublane, (m // 2 // sublane) * sublane)   # >= 2 steps
    target_rows = max(sublane,
                      (_TARGET_BLOCK_BYTES // row_bytes) // sublane * sublane)
    desired = min(max_tile, target_rows)

    # Prefer (in order): a divisor of m giving an EVEN step count, any
    # divisor, then the raw desired tile (ragged tail handled by cdiv with
    # masked stores).  Search only a [desired/2, desired] window.
    best_div = None
    lo = max(sublane, desired // 2)
    t = desired
    while t >= lo:
        if m % t == 0:
            if (m // t) % 2 == 0:
                return t
            if best_div is None:
                best_div = t
        t -= sublane
    return best_div if best_div is not None else desired


def photobleach_background(x, a, b):
    """Apply y = a * x + b with a, b of shape sh broadcasting against x.

    x : (..., *sh)  (e.g. (H, W, *sh) PSF stack)
    a : sh
    b : sh
    """
    sh = a.shape
    assert b.shape == sh
    assert x.shape[x.ndim - len(sh):] == sh

    d = math.prod(sh) if sh else 1
    total = math.prod(x.shape)
    itemsize = jnp.dtype(x.dtype).itemsize
    sublane = _sublane(itemsize)

    a_flat = a.reshape(-1).astype(jnp.float32)
    b_flat = b.reshape(-1).astype(jnp.float32)

    x_flat = x.reshape(-1)
    padded = False
    w = _pick_lane_width(total, d)
    total_eff = total
    if w is None:
        base = _lcm(d, _LANE)
        if base <= _MAX_LANE_GUARD:
            # Lane-dense via zero padding: pad flat array up to a multiple of
            # base*k, run the lane-dense kernel, slice the result back.
            w = base * max(1, _MAX_LANE_WIDTH // base)
            total_eff = pl.cdiv(total, w) * w
            if total_eff != total:
                x_flat = jnp.pad(x_flat, (0, total_eff - total))
                padded = True
        else:
            # TODO(synk): pathological diversity size (lcm(d,128) huge) — fall
            # back to masked stores with d on the lane axis.
            w = d
            total_eff = total

    m = total_eff // w
    rep = w // d
    x2 = x_flat.reshape(m, w)
    a2 = jnp.tile(a_flat, rep).reshape(1, w)
    b2 = jnp.tile(b_flat, rep).reshape(1, w)

    tm = _pick_row_tile(m, w, itemsize, sublane)
    grid = (pl.cdiv(m, tm),)

    # VMEM budget: double-buffered input + output blocks plus the a/b rows.
    block_bytes = tm * w * itemsize
    ab_bytes = 2 * w * 4
    needed = 2 * (2 * block_bytes + ab_bytes)
    vmem_limit = int(min(max(needed + _VMEM_HEADROOM, 32 << 20), 48 << 20))

    cost = pl.CostEstimate(
        flops=2 * total,
        transcendentals=0,
        bytes_accessed=2 * total * itemsize + 2 * d * 4,
    )

    out2 = pl.pallas_call(
        _pbb_kernel,
        out_shape=jax.ShapeDtypeStruct((m, w), x.dtype),
        grid_spec=pltpu.PrefetchScalarGridSpec(
            num_scalar_prefetch=0,
            grid=grid,
            in_specs=[
                pl.BlockSpec((1, w), lambda i: (0, 0)),    # a row (VMEM-resident)
                pl.BlockSpec((1, w), lambda i: (0, 0)),    # b row (VMEM-resident)
                pl.BlockSpec((tm, w), lambda i: (i, 0)),   # x tile
            ],
            out_specs=pl.BlockSpec((tm, w), lambda i: (i, 0)),
        ),
        compiler_params=pltpu.CompilerParams(
            # Parallel row axis -> v7x megacore splits the stream when grid > 1.
            dimension_semantics=("parallel",),
            vmem_limit_bytes=vmem_limit,
        ),
        cost_estimate=cost,
    )(a2, b2, x2)

    out_flat = out2.reshape(-1)
    if padded:
        out_flat = out_flat[:total]
    return out_flat.reshape(x.shape)


def _check(x, a, b):
    y = jax.block_until_ready(photobleach_background(x, a, b))
    y_ref = a * x + b
    assert y.shape == x.shape
    assert jnp.allclose(y, y_ref, atol=1e-6, rtol=1e-6), "mismatch vs reference"
    return y


if __name__ == "__main__":
    # Module config: sh = [8] diversities, b_est = 0.5, opt_a/opt_b = True.
    sh = (8,)
    b_est = 0.5

    # Deterministic "parameter" init exactly as __init__ does:
    #   a = ones(sh), b = b_est * ones(sh); perturb deterministically so the
    #   affine map is non-trivial but reproducible.
    a_param = jnp.ones(sh, dtype=jnp.float32)
    b_param = b_est * jnp.ones(sh, dtype=jnp.float32)
    a_param = a_param + 0.25 * jnp.arange(sh[0], dtype=jnp.float32) / sh[0]
    b_param = b_param + 0.10 * jnp.arange(sh[0], dtype=jnp.float32) / sh[0]

    key = jax.random.PRNGKey(0)
    k1, k2, k3 = jax.random.split(key, 3)

    # 1) Small PSF-stack size (single lane-dense block, grid=(1,)).
    x_small = jax.random.normal(k1, (16, 16) + sh, dtype=jnp.float32)
    _check(x_small, a_param, b_param)

    # 2) Mid-size stack exercising the multi-step parallel grid (W=2048,
    #    even step count so both v7x TensorCores stream).
    x_mid = jax.random.normal(k2, (128, 256) + sh, dtype=jnp.float32)
    _check(x_mid, a_param, b_param)

    # 3) Awkward diversity size (d=3) hitting the padded lane-dense path.
    sh3 = (3,)
    a3 = 1.0 + 0.5 * jnp.arange(3, dtype=jnp.float32)
    b3 = 0.25 * jnp.ones(sh3, dtype=jnp.float32)
    x3 = jax.random.normal(k3, (7, 5) + sh3, dtype=jnp.float32)
    _check(x3, a3, b3)

    print("KERNEL_OK")
</pallas_src>

<mosaic_0001>
module attributes {stable_mosaic.version = 11 : i64} {
  func.func @_pbb_kernel(%arg0: i32, %arg1: memref<1x2048xf32, #tpu.memory_space<vmem>>, %arg2: memref<1x2048xf32, #tpu.memory_space<vmem>>, %arg3: memref<1x2048xf32, #tpu.memory_space<vmem>>, %arg4: memref<1x2048xf32, #tpu.memory_space<vmem>>) attributes {dimension_semantics = [#tpu.dimension_semantics<parallel>], iteration_bounds = array<i64: 1>, scalar_prefetch = 0 : i64, scratch_operands = 0 : i64, tpu.core_type = #tpu.core_type<tc>, window_params = [{pipeline_mode = #tpu.pipeline_mode<synchronous>, transform_indices = @transform_0, window_bounds = array<i64: 1, 2048>}, {pipeline_mode = #tpu.pipeline_mode<synchronous>, transform_indices = @transform_1, window_bounds = array<i64: 1, 2048>}, {transform_indices = @transform_2, window_bounds = array<i64: 1, 2048>}, {transform_indices = @transform_3, window_bounds = array<i64: 1, 2048>}]} {
    %c0 = arith.constant 0 : index
    %c0_0 = arith.constant 0 : index
    %0 = vector.load %arg3[%c0, %c0_0] : memref<1x2048xf32, #tpu.memory_space<vmem>>, vector<1x2048xf32>
    %c0_1 = arith.constant 0 : index
    %c0_2 = arith.constant 0 : index
    %1 = vector.load %arg1[%c0_1, %c0_2] : memref<1x2048xf32, #tpu.memory_space<vmem>>, vector<1x2048xf32>
    %2 = arith.mulf %1, %0 : vector<1x2048xf32>
    %c0_3 = arith.constant 0 : index
    %c0_4 = arith.constant 0 : index
    %3 = vector.load %arg2[%c0_3, %c0_4] : memref<1x2048xf32, #tpu.memory_space<vmem>>, vector<1x2048xf32>
    %4 = arith.addf %2, %3 : vector<1x2048xf32>
    %c0_5 = arith.constant 0 : index
    %c0_6 = arith.constant 0 : index
    %5 = vector.load %arg4[%c0_5, %c0_6] : memref<1x2048xf32, #tpu.memory_space<vmem>>, vector<1x2048xf32>
    tpu.vector_store %arg4[%c0_5, %c0_6], %4 {strides = array<i32>} : memref<1x2048xf32, #tpu.memory_space<vmem>>, vector<1x2048xf32>,
    return
  }
  func.func @transform_0(%arg0: i32) -> (i32, i32) {
    %c0_i32 = arith.constant 0 : i32
    %c0_i32_0 = arith.constant 0 : i32
    %c0_i32_1 = arith.constant 0 : i32
    return %c0_i32, %c0_i32_0 : i32, i32
  }
  func.func @transform_1(%arg0: i32) -> (i32, i32) {
    %c0_i32 = arith.constant 0 : i32
    %c0_i32_0 = arith.constant 0 : i32
    %c0_i32_1 = arith.constant 0 : i32
    return %c0_i32, %c0_i32_0 : i32, i32
  }
  func.func @transform_2(%arg0: i32) -> (i32, i32) {
    %c0_i32 = arith.constant 0 : i32
    %c0_i32_0 = arith.constant 0 : i32
    return %arg0, %c0_i32 : i32, i32
  }
  func.func @transform_3(%arg0: i32) -> (i32, i32) {
    %c0_i32 = arith.constant 0 : i32
    %c0_i32_0 = arith.constant 0 : i32
    return %arg0, %c0_i32 : i32, i32
  }
}

</mosaic_0001>

<bundles_post_ra>
// kernel: tpu_custom_call.1
= control target key start
LH: loop header
LB: loop body
LE: loop exit
PB: predicated region body
PF: predicated region fallthrough
CT: control target
= control target key end

     0   :  { %8 = vsyncpa [#allocation3], 0  ;;  %s204_s0 = inlined_call_operand.hbm [shape: f32[1,2048], index: 0, kind: input, shape index: {}]   ;;  %s205_s1 = inlined_call_operand.hbm [shape: f32[1,2048], index: 1, kind: input, shape index: {}]   ;;  %s206_s2 = inlined_call_operand.hbm [shape: f32[1,2048], index: 2, kind: input, shape index: {}]   ;;  %s207_s3 = inlined_call_operand.hbm [shape: f32[1,2048], index: 3, kind: output, shape index: {}]  }
   0x1   :  { %9 = vsyncpa [#allocation6], 0 }
   0x2   :  { %10 = vsyncpa [#allocation4], 0  ;;  %s168_s12 = smov [#allocation5]   ;;  %s169_s14 = smov [#allocation2]  }
   0x3   :  { %s27_s13 = sshll.u32 %s168_s12, 4  ;;  %s17_s15 = sshll.u32 %s169_s14, 4  ;;  %s28_s13 = int_to_ptr.vmem [resolvable:$true] %s27_s13  ;;  %s18_s15 = int_to_ptr.vmem [resolvable:$true] %s17_s15 }
   0x4   :  { %s90_s16 = scalar_lea.vmem %s28_s13, 256  ;;  %p95_p1 = scmp.lt.s32.totalorder %s28_s13, %s28_s13 }
   0x5   :  { %p91_p0 = scmp.ne.s32.totalorder %s28_s13, %s90_s16  ;;  %p96_p2 = scmp.lt.s32.totalorder %s90_s16, %s90_s16 }
   0x7   :  { %p97_p3 = por %p96_p2, %p95_p1 }
   0x9   :  { %p98_p4 = pnand %p97_p3, %p91_p0 }
   0xb   :  { %101 = shalt.err (!%p98_p4)
}
   0xc   :  { %30 = dma.hbm_to_vmem [thread:$0]  %s205_s1, 256, %s28_s13, [#allocation6]  }
   0xd   :  { %s110_s19 = scalar_lea.vmem %s18_s15, 256  ;;  %p115_p6 = scmp.lt.s32.totalorder %s18_s15, %s18_s15 }
   0xe   :  { %p111_p5 = scmp.ne.s32.totalorder %s18_s15, %s110_s19  ;;  %p116_p7 = scmp.lt.s32.totalorder %s110_s19, %s110_s19 }
  0x10   :  { %p117_p8 = por %p116_p7, %p115_p6 }
  0x12   :  { %p118_p9 = pnand %p117_p8, %p111_p5 }
  0x14   :  { %121 = shalt.err (!%p118_p9)
}
  0x15   :  { %20 = dma.hbm_to_vmem [thread:$0]  %s204_s0, 256, %s18_s15, [#allocation3]  }
  0x16   :  { %s170_s22 = smov [#allocation7]  }
  0x17   :  { %s37_s23 = sshll.u32 %s170_s22, 4  ;;  %s38_s23 = int_to_ptr.vmem [resolvable:$true] %s37_s23 }
  0x18   :  { %s130_s24 = scalar_lea.vmem %s38_s23, 256  ;;  %p135_p11 = scmp.lt.s32.totalorder %s38_s23, %s38_s23 }
  0x19   :  { %p131_p10 = scmp.ne.s32.totalorder %s38_s23, %s130_s24  ;;  %p136_p12 = scmp.lt.s32.totalorder %s130_s24, %s130_s24 }
  0x1b   :  { %p137_p13 = por %p136_p12, %p135_p11 }
  0x1d   :  { %p138_p0 = pnand %p137_p13, %p131_p10 }
  0x1f   :  { %141 = shalt.err (!%p138_p0)
}
  0x20   :  { %40 = dma.hbm_to_vmem [thread:$0]  %s206_s2, 256, %s38_s23, [#allocation6]  }
  0x21   :  { %162 = dma.done.wait [#allocation3], 256  }
  0x22   :  { %163 = vsyncadd [#allocation3], 4294967040 }
  0x23   :  { %164 = dma.done.wait [#allocation6], 512  }
  0x24   :  { %165 = vsyncadd [#allocation6], 4294966784  ;;  %v50_v0 = vld [vmem:[#allocation7] sm:$0xff]  ;;  %v56_v2 = vld [vmem:[#allocation5] sm:$0xff]  ;;  %s171_s0 = smov [#allocation8]  }
  0x25   :  { %v52_v1 = vld [vmem:[#allocation2] sm:$0xff]  ;;  %v51_v4 = vld [vmem:[#allocation7 + $0x8] sm:$0xff]  ;;  %v57_v6 = vld [vmem:[#allocation5 + $0x8] sm:$0xff]  ;;  %s68_s26 = sshll.u32 %s171_s0, 4  ;;  %s69_s26 = int_to_ptr.vmem [resolvable:$true] %s68_s26 }
  0x26   :  { %v54_v3 = vmul.f32 %v52_v1, %v50_v0  ;;  %v53_v5 = vld [vmem:[#allocation2 + $0x8] sm:$0xff]  ;;  %s142_s2 = scalar_lea.vmem %s69_s26, 256  ;;  %p147_p2 = scmp.lt.s32.totalorder %s69_s26, %s69_s26 }
  0x27   :  { %v55_v7 = vmul.f32 %v53_v5, %v51_v4  ;;  %p143_p1 = scmp.ne.s32.totalorder %s69_s26, %s142_s2  ;;  %p148_p3 = scmp.lt.s32.totalorder %s142_s2, %s142_s2 }
  0x28   :  { %v58_v8 = vadd.f32 %v56_v2, %v54_v3 }
  0x29   :  { %v59_v9 = vadd.f32 %v57_v6, %v55_v7  ;;  %p149_p4 = por %p148_p3, %p147_p2 }
  0x2a   :  { %60 = vst [vmem:[#allocation8] sm:$0xff] %v58_v8 }
  0x2b   :  { %61 = vst [vmem:[#allocation8 + $0x8] sm:$0xff] %v59_v9  ;;  %p150_p5 = pnand %p149_p4, %p143_p1 }
  0x2d   :  { %153 = shalt.err (!%p150_p5)
}
  0x2e   :  { %71 = dma.vmem_to_hbm [thread:$0]  %s69_s26, 256, %s207_s3, [#allocation4]  }
  0x2f   :  { %166 = dma.done.wait [#allocation4], 256  }
  0x30   :  { %167 = vsyncadd [#allocation4], 4294967040 }
  0x31   :  { %75 = vsyncpa [#allocation3], 1 }
  0x32   :  { %76 = vsyncpa [#allocation6], 1 }
  0x33   :  { %77 = vsyncpa [#allocation4], 1 }

</bundles_post_ra>
